<compile_context>
chip_gen: v6e
topology: v6e:2x2x1
jax: 0.10.0
libtpu: 0.0.40
codegen_flags: <defaults>
</compile_context>

<pallas_src>
import math

import jax
import jax.numpy as jnp
from jax.experimental import pallas as pl
from jax.experimental.pallas import tpu as pltpu


def linear_permute_kernel(x_ref, w_ref, b_ref, o_ref):
    """Fused linear + permute(0, 2, 1); single grid point; VPU-only.

    x_ref: (B, IN, S)   VMEM  input activations, reduction axis on sublanes
    w_ref: (OUT*IN,)    SMEM  flattened linear weight (PyTorch layout), scalar reads
    b_ref: (OUT,)       SMEM  bias, scalar reads
    o_ref: (B, OUT, S)  VMEM  output, already in permuted layout
    """
    B, IN, S = x_ref.shape
    OUT = o_ref.shape[1]

    x = x_ref[...]  # (B, IN, S) — one tiny vector load

    # out[b, o, s] = sum_i w[o, i] * x[b, i, s] + b[o]
    # Fully unrolled scalar*vector multiply-adds on the VALU slots.
    # `x[:, i, :]` is a sublane slice (no lane relayout); the permute is absorbed
    # by assembling rows directly in (B, OUT, S) order.
    rows = []
    for o in range(OUT):
        acc = x[:, 0, :] * w_ref[o * IN + 0]
        for i in range(1, IN):
            acc = acc + x[:, i, :] * w_ref[o * IN + i]
        acc = acc + b_ref[o]
        rows.append(acc[:, None, :])  # (B, 1, S)

    # Single full-block store (one vst instead of OUT masked per-row stores).
    o_ref[...] = jnp.concatenate(rows, axis=1).astype(o_ref.dtype)


def linear_permute(x, weight, bias):
    """x: (B, S, IN) f32, weight: (OUT, IN), bias: (OUT,). Returns (B, OUT, S)."""
    B, S, IN = x.shape
    OUT = weight.shape[0]

    # Put the reduction axis (IN) on sublanes and S on lanes before the kernel;
    # at this size the transpose is 4 floats — layout hygiene, not compute.
    x_t = jnp.swapaxes(x, 1, 2)          # (B, IN, S)
    w_flat = weight.reshape(OUT * IN)    # 1-D SMEM: avoids 2-D SMEM padding

    return pl.pallas_call(
        linear_permute_kernel,
        out_shape=jax.ShapeDtypeStruct((B, OUT, S), x.dtype),
        # No grid: whole (tiny) problem handled in a single kernel invocation.
        in_specs=[
            pl.BlockSpec(memory_space=pltpu.MemorySpace.VMEM),   # x (B, IN, S)
            pl.BlockSpec(memory_space=pltpu.MemorySpace.SMEM),   # weight (flat scalars)
            pl.BlockSpec(memory_space=pltpu.MemorySpace.SMEM),   # bias   (scalars)
        ],
        out_specs=pl.BlockSpec(memory_space=pltpu.MemorySpace.VMEM),
    )(x_t, w_flat, bias)


if __name__ == "__main__":
    # Shapes implied by the PyTorch module: x0 = torch.randn(1, 2, 2), Linear(2, 3)
    B, S, IN, OUT = 1, 2, 2, 3

    key = jax.random.PRNGKey(0)
    kx, kw, kb = jax.random.split(key, 3)

    x0 = jax.random.normal(kx, (B, S, IN), dtype=jnp.float32)

    # Deterministic Linear(2, 3) parameters (PyTorch-style uniform(-1/sqrt(IN), 1/sqrt(IN)))
    bound = 1.0 / math.sqrt(IN)
    weight = jax.random.uniform(kw, (OUT, IN), jnp.float32, -bound, bound)
    bias = jax.random.uniform(kb, (OUT,), jnp.float32, -bound, bound)

    v1 = linear_permute(x0, weight, bias)            # (1, 3, 2)
    jax.block_until_ready(v1)

    # Sanity check against plain-JAX reference of the same fused math.
    ref = jnp.transpose(jnp.einsum("bsi,oi->bso", x0, weight) + bias, (0, 2, 1))
    assert v1.shape == (B, OUT, S)
    assert jnp.allclose(v1, ref, atol=1e-5, rtol=1e-5)

    print("KERNEL_OK")
</pallas_src>

<mosaic_0001>
module attributes {stable_mosaic.version = 11 : i64} {
  func.func @linear_permute_kernel(%arg0: memref<1x2x2xf32, #tpu.memory_space<vmem>>, %arg1: memref<6xf32, #tpu.memory_space<smem>>, %arg2: memref<3xf32, #tpu.memory_space<smem>>, %arg3: memref<1x3x2xf32, #tpu.memory_space<vmem>>) attributes {dimension_semantics = [], scalar_prefetch = 0 : i64, scratch_operands = 0 : i64, tpu.core_type = #tpu.core_type<tc>} {
    %c0 = arith.constant 0 : index
    %c0_0 = arith.constant 0 : index
    %c0_1 = arith.constant 0 : index
    %0 = vector.load %arg0[%c0, %c0_0, %c0_1] : memref<1x2x2xf32, #tpu.memory_space<vmem>>, vector<1x2x2xf32>
    %1 = vector.extract_strided_slice %0 {offsets = [0, 0, 0], sizes = [1, 1, 2], strides = [1, 1, 1]} : vector<1x2x2xf32> to vector<1x1x2xf32>
    %2 = vector.shape_cast %1 : vector<1x1x2xf32> to vector<1x2xf32>
    %c0_2 = arith.constant 0 : index
    %3 = memref.load %arg1[%c0_2] : memref<6xf32, #tpu.memory_space<smem>>
    %4 = vector.broadcast %3 : f32 to vector<1x2xf32>
    %5 = arith.mulf %2, %4 : vector<1x2xf32>
    %6 = vector.extract_strided_slice %0 {offsets = [0, 1, 0], sizes = [1, 1, 2], strides = [1, 1, 1]} : vector<1x2x2xf32> to vector<1x1x2xf32>
    %7 = vector.shape_cast %6 : vector<1x1x2xf32> to vector<1x2xf32>
    %c1 = arith.constant 1 : index
    %8 = memref.load %arg1[%c1] : memref<6xf32, #tpu.memory_space<smem>>
    %9 = vector.broadcast %8 : f32 to vector<1x2xf32>
    %10 = arith.mulf %7, %9 : vector<1x2xf32>
    %11 = arith.addf %5, %10 : vector<1x2xf32>
    %c0_3 = arith.constant 0 : index
    %12 = memref.load %arg2[%c0_3] : memref<3xf32, #tpu.memory_space<smem>>
    %13 = vector.broadcast %12 : f32 to vector<1x2xf32>
    %14 = arith.addf %11, %13 : vector<1x2xf32>
    %15 = vector.shape_cast %14 : vector<1x2xf32> to vector<1x1x2xf32>
    %16 = vector.extract_strided_slice %0 {offsets = [0, 0, 0], sizes = [1, 1, 2], strides = [1, 1, 1]} : vector<1x2x2xf32> to vector<1x1x2xf32>
    %17 = vector.shape_cast %16 : vector<1x1x2xf32> to vector<1x2xf32>
    %c2 = arith.constant 2 : index
    %18 = memref.load %arg1[%c2] : memref<6xf32, #tpu.memory_space<smem>>
    %19 = vector.broadcast %18 : f32 to vector<1x2xf32>
    %20 = arith.mulf %17, %19 : vector<1x2xf32>
    %21 = vector.extract_strided_slice %0 {offsets = [0, 1, 0], sizes = [1, 1, 2], strides = [1, 1, 1]} : vector<1x2x2xf32> to vector<1x1x2xf32>
    %22 = vector.shape_cast %21 : vector<1x1x2xf32> to vector<1x2xf32>
    %c3 = arith.constant 3 : index
    %23 = memref.load %arg1[%c3] : memref<6xf32, #tpu.memory_space<smem>>
    %24 = vector.broadcast %23 : f32 to vector<1x2xf32>
    %25 = arith.mulf %22, %24 : vector<1x2xf32>
    %26 = arith.addf %20, %25 : vector<1x2xf32>
    %c1_4 = arith.constant 1 : index
    %27 = memref.load %arg2[%c1_4] : memref<3xf32, #tpu.memory_space<smem>>
    %28 = vector.broadcast %27 : f32 to vector<1x2xf32>
    %29 = arith.addf %26, %28 : vector<1x2xf32>
    %30 = vector.shape_cast %29 : vector<1x2xf32> to vector<1x1x2xf32>
    %31 = vector.extract_strided_slice %0 {offsets = [0, 0, 0], sizes = [1, 1, 2], strides = [1, 1, 1]} : vector<1x2x2xf32> to vector<1x1x2xf32>
    %32 = vector.shape_cast %31 : vector<1x1x2xf32> to vector<1x2xf32>
    %c4 = arith.constant 4 : index
    %33 = memref.load %arg1[%c4] : memref<6xf32, #tpu.memory_space<smem>>
    %34 = vector.broadcast %33 : f32 to vector<1x2xf32>
    %35 = arith.mulf %32, %34 : vector<1x2xf32>
    %36 = vector.extract_strided_slice %0 {offsets = [0, 1, 0], sizes = [1, 1, 2], strides = [1, 1, 1]} : vector<1x2x2xf32> to vector<1x1x2xf32>
    %37 = vector.shape_cast %36 : vector<1x1x2xf32> to vector<1x2xf32>
    %c5 = arith.constant 5 : index
    %38 = memref.load %arg1[%c5] : memref<6xf32, #tpu.memory_space<smem>>
    %39 = vector.broadcast %38 : f32 to vector<1x2xf32>
    %40 = arith.mulf %37, %39 : vector<1x2xf32>
    %41 = arith.addf %35, %40 : vector<1x2xf32>
    %c2_5 = arith.constant 2 : index
    %42 = memref.load %arg2[%c2_5] : memref<3xf32, #tpu.memory_space<smem>>
    %43 = vector.broadcast %42 : f32 to vector<1x2xf32>
    %44 = arith.addf %41, %43 : vector<1x2xf32>
    %45 = vector.shape_cast %44 : vector<1x2xf32> to vector<1x1x2xf32>
    %46 = tpu.concatenate %15, %30, %45 in 1 : vector<1x1x2xf32>, vector<1x1x2xf32>, vector<1x1x2xf32> -> vector<1x3x2xf32>
    %c0_6 = arith.constant 0 : index
    %c0_7 = arith.constant 0 : index
    %c0_8 = arith.constant 0 : index
    %47 = vector.load %arg3[%c0_6, %c0_7, %c0_8] : memref<1x3x2xf32, #tpu.memory_space<vmem>>, vector<1x3x2xf32>
    tpu.vector_store %arg3[%c0_6, %c0_7, %c0_8], %46 {strides = array<i32>} : memref<1x3x2xf32, #tpu.memory_space<vmem>>, vector<1x3x2xf32>,
    return
  }
}

</mosaic_0001>

<bundles_post_ra>
// kernel: tpu_custom_call.1
= control target key start
LH: loop header
LB: loop body
LE: loop exit
PB: predicated region body
PF: predicated region fallthrough
CT: control target
= control target key end

     0   :  { %8 = vsyncpa [#allocation3], 0  ;;  %s205_s0 = inlined_call_operand.hbm [shape: f32[1,2,2], index: 0, kind: input, shape index: {}]   ;;  %s206_s1 = inlined_call_operand.vmem [shape: f32[6], index: 1, kind: input, shape index: {}]   ;;  %s207_s2 = inlined_call_operand.vmem [shape: f32[3], index: 2, kind: input, shape index: {}]   ;;  %s208_s3 = inlined_call_operand.vmem [shape: f32[1,3,2], index: 3, kind: output, shape index: {}]  }
   0x1   :  { %9 = vsyncpa [#allocation4], 0  ;;  %s27_s14 = sshll.u32 %s206_s1, 4  ;;  %s28_s14 = int_to_ptr.vmem [resolvable:$true] %s27_s14 }
   0x2   :  { %10 = vsyncpa [#allocation7], 0  ;;  %s170_s15 = smov [#allocation2]  }
   0x3   :  { %s17_s16 = sshll.u32 %s170_s15, 4  ;;  %s18_s16 = int_to_ptr.vmem [resolvable:$true] %s17_s16 }
   0x4   :  { %s128_s17 = scalar_lea.vmem %s18_s16, 32  ;;  %p133_p1 = scmp.lt.s32.totalorder %s18_s16, %s18_s16 }
   0x5   :  { %p129_p0 = scmp.ne.s32.totalorder %s18_s16, %s128_s17  ;;  %p134_p2 = scmp.lt.s32.totalorder %s128_s17, %s128_s17 }
   0x7   :  { %p135_p3 = por %p134_p2, %p133_p1 }
   0x9   :  { %p136_p4 = pnand %p135_p3, %p129_p0 }
   0xb   :  { %139 = shalt.err (!%p136_p4)
}
   0xc   :  { %20 = dma.hbm_to_vmem [thread:$0]  %s205_s0, 32, %s18_s16, [#allocation3]  }
   0xd   :  { %s140_s20 = scalar_lea.vmem %s28_s14, 16  ;;  %p145_p6 = scmp.lt.s32.totalorder %s28_s14, %s28_s14 }
   0xe   :  { %p141_p5 = scmp.ne.s32.totalorder %s28_s14, %s140_s20  ;;  %p146_p7 = scmp.lt.s32.totalorder %s140_s20, %s140_s20 }
  0x10   :  { %p147_p8 = por %p146_p7, %p145_p6 }
  0x12   :  { %p148_p9 = pnand %p147_p8, %p141_p5 }
  0x14   :  { %151 = shalt.err (!%p148_p9)
}
  0x15   :  { %s171_s1 = smov [#allocation5]   ;;  %s37_s23 = sshll.u32 %s207_s2, 4  ;;  %s38_s23 = int_to_ptr.vmem [resolvable:$true] %s37_s23 }
  0x16   :  { %30 = dma.vmem_to_smem %s28_s14, 16, %s171_s1, [#allocation4]  }
  0x17   :  { %s152_s24 = scalar_lea.vmem %s38_s23, 16  ;;  %p157_p11 = scmp.lt.s32.totalorder %s38_s23, %s38_s23 }
  0x18   :  { %p153_p10 = scmp.ne.s32.totalorder %s38_s23, %s152_s24  ;;  %p158_p12 = scmp.lt.s32.totalorder %s152_s24, %s152_s24 }
  0x1a   :  { %p159_p13 = por %p158_p12, %p157_p11 }
  0x1c   :  { %p160_p0 = pnand %p159_p13, %p153_p10 }
  0x1e   :  { %163 = shalt.err (!%p160_p0)
}
  0x1f   :  { %s172_s0 = smov [#allocation6]  }
  0x20   :  { %40 = dma.vmem_to_smem %s38_s23, 16, %s172_s0, [#allocation7]  }
  0x21   :  { %164 = dma.done.wait [#allocation3], 32  }
  0x22   :  { %165 = vsyncadd [#allocation3], 4294967264 }
  0x23   :  { %166 = dma.done.wait [#allocation4], 16  }
  0x24   :  { %167 = vsyncadd [#allocation4], 4294967280 }
  0x25   :  { %168 = dma.done.wait [#allocation7], 16  }
  0x26   :  { %169 = vsyncadd [#allocation7], 4294967280 }
  0x27   :  { %50 = sfence }
  0x28   :  { %s52_s25 = sld [smem:[#allocation5]]  ;;  %v51_v1 = vld [vmem:[#allocation2] sm:$0x3]  ;;  %vm97_vm0 = vcmask 1040384   ;;  %vm99_vm1 = vcmask 1041408   ;;  %vm101_vm2 = vcmask 10240  }
  0x29   :  { %s110_s26 = sld [smem:[#allocation5 + $0x1]] }
  0x2a   :  { %s62_s2 = sld [smem:[#allocation6]] }
  0x2b   :  { %s111_s27 = sld [smem:[#allocation5 + $0x2]] }
  0x2c   :  { %s112_s28 = sld [smem:[#allocation5 + $0x3]] }
  0x2d   :  { %s113_s29 = sld [smem:[#allocation6 + $0x1]] }
  0x2e   :  { %v53_v0 = vstv %s52_s25  ;;  %s114_s30 = sld [smem:[#allocation5 + $0x4]] }
  0x2f   :  { %v56_v2 = vstv %s110_s26  ;;  %s115_s4 = sld [smem:[#allocation5 + $0x5]]  ;;  %v54_v4 = vmul.f32 %v53_v0, %v51_v1 }
  0x30   :  { %v57_v3 = vmul.f32 %v56_v2, %v51_v1  ;;  %s116_s5 = sld [smem:[#allocation6 + $0x2]]  ;;  %v63_v14 = vstv %s62_s2 }
  0x31   :  { %v66_v5 = vstv %s111_s27 }
  0x32   :  { %v59_v6 = vrot.slane %v57_v3, 1  ;;  %v69_v7 = vstv %s112_s28  ;;  %v67_v8 = vmul.f32 %v66_v5, %v51_v1 }
  0x33   :  { %v70_v9 = vmul.f32 %v69_v7, %v51_v1  ;;  %v76_v15 = vstv %s113_s29 }
  0x34   :  { %v79_v10 = vstv %s114_s30  ;;  %v61_v11 = vadd.f32 %v59_v6, %v54_v4 }
  0x35   :  { %v72_v12 = vrot.slane %v70_v9, 1  ;;  %v82_v13 = vstv %s115_s4  ;;  %v80_v16 = vmul.f32 %v79_v10, %v51_v1 }
  0x36   :  { %v83_v17 = vmul.f32 %v82_v13, %v51_v1  ;;  %v64_v20 = vadd.f32 %v63_v14, %v61_v11  ;;  %v89_v22 = vstv %s116_s5 }
  0x37   :  { %v74_v18 = vadd.f32 %v72_v12, %v67_v8 }
  0x38   :  { %v85_v19 = vrot.slane %v83_v17, 1 }
  0x39   :  { %v77_v21 = vadd.f32 %v76_v15, %v74_v18 }
  0x3a   :  { %v87_v23 = vadd.f32 %v85_v19, %v80_v16 }
  0x3b   :  { %v92_v24 = vrot.slane %v77_v21, 7 }
  0x3c   :  { %v90_v25 = vadd.f32 %v89_v22, %v87_v23 }
  0x3d   :  { %v98_v26 = vsel %vm97_vm0, %v64_v20, %v92_v24 }
  0x3e   :  { %v95_v27 = vrot.slane %v90_v25, 6 }
  0x40   :  { %v100_v28 = vsel %vm99_vm1, %v98_v26, %v95_v27 }
  0x41   :  { %102 = vst.msk [vmem:[%s208_s3] sm:$0x7] %vm101_vm2, %v100_v28 }
  0x42   :  { %107 = vsyncpa [#allocation3], 1 }
  0x43   :  { %108 = vsyncpa [#allocation4], 1 }
  0x44   :  { %109 = vsyncpa [#allocation7], 1 }

</bundles_post_ra>
